<compile_context>
chip_gen: v7x
topology: tpu7x:2x2x1
jax: 0.10.0
libtpu: 0.0.40
codegen_flags: <defaults>
</compile_context>

<pallas_src>
import functools

import jax
import jax.numpy as jnp
from jax.experimental import pallas as pl
from jax.experimental.pallas import tpu as pltpu

LANE = 128
SUBLANE = 8


def _round_up(x, m):
    return (x + m - 1) // m * m


def gpn_kernel(x_ref, v_ref, w_ref, bias_ref, spike_ref, vnew_ref, *, c, cp):
    x = x_ref[...]                      # (TB, C) f32
    v = v_ref[...]                      # (TB, C) f32

    # cat([v, x], dim=1) @ W.T + bias as one K=2C bf16 matmul, f32 accumulate.
    comb = jnp.concatenate([v, x], axis=-1).astype(jnp.bfloat16)   # (TB, 2C)
    z = (jnp.dot(comb, w_ref[...], preferred_element_type=jnp.float32)
         + bias_ref[...])               # (TB, 4*Cp) f32

    # Gate k occupies columns [k*Cp, k*Cp + C): lane-aligned start (Cp % 128
    # == 0), so extracting a gate never shifts across vreg boundaries.
    def gate(k):
        return z[:, k * cp:k * cp + c]

    # sigmoid(u) == 0.5 * (tanh(0.5 * u) + 1): 1 EUP push instead of 2.
    def sig(u):
        return 0.5 * (jnp.tanh(0.5 * u) + 1.0)

    f = sig(gate(0))
    i = sig(gate(1))
    b = jnp.tanh(gate(2))
    t = sig(gate(3))

    v_hidden = f * v + i * x

    # surrogate.ATan forward pass is a Heaviside step (the ATan only shapes
    # the backward gradient, irrelevant for the forward kernel).
    mask = v_hidden >= t
    spike = mask.astype(spike_ref.dtype)
    # Eval mode: v_reset == 0, so (1-s)*v_hidden + s*v_reset + b is a select.
    v_new = jnp.where(mask, 0.0, v_hidden) + b

    spike_ref[...] = spike
    vnew_ref[...] = v_new.astype(vnew_ref.dtype)


def gpn_prepare_params(w, bias, c, cp):
    """One-time parameter preprocessing (hoisted out of the per-step path).

    w: (4C, 2C) nn.Linear weight, bias: (4C,).
    Returns:
      w_p    (2C, 4*Cp) bf16 -- W.T with each gate's output columns padded
             from width C to width Cp so gate slices of z are lane-aligned.
             The contraction (K=2C) dim is NOT padded.
      bias_p (1, 4*Cp) f32.
    """
    wt = w.T.astype(jnp.float32)                       # (2C, 4C)
    w_p = jnp.zeros((2 * c, 4 * cp), jnp.float32)
    bias_p = jnp.zeros((1, 4 * cp), jnp.float32)
    for k in range(4):
        w_p = w_p.at[:, k * cp:k * cp + c].set(wt[:, k * c:(k + 1) * c])
        bias_p = bias_p.at[0, k * cp:k * cp + c].set(bias[k * c:(k + 1) * c])
    return w_p.astype(jnp.bfloat16), bias_p


def _pick_batch_tile(b_dim, c, cp, weight_bytes, vmem_cap):
    """Largest MXU-friendly batch tile that fits the VMEM budget."""
    if b_dim < 128:
        return _round_up(max(b_dim, 1), SUBLANE)
    budget = vmem_cap - weight_bytes - (8 << 20)
    for tb in (512, 256, 128):
        if tb > b_dim:
            continue
        # 4 activation-sized streams double-buffered + ~4x z-sized live f32.
        tile_bytes = 4 * 2 * tb * c * 4 + 4 * tb * 4 * cp * 4
        if tile_bytes <= budget:
            return tb
    return 128


def gpn_forward(x, v, w_p, bias_p, c):
    """x, v: (B, C) f32 (v is the carried membrane state; zeros on first call).
    w_p/bias_p from gpn_prepare_params.  Returns (spike, v_new), both (B, C)."""
    b_dim = x.shape[0]
    assert x.shape == (b_dim, c) and v.shape == (b_dim, c)
    two_c, four_cp = w_p.shape
    assert two_c == 2 * c and four_cp % 4 == 0
    cp = four_cp // 4
    assert bias_p.shape == (1, four_cp)

    # Clamp the VMEM limit to the real chip capacity (v7x: 64 MiB per TC).
    try:
        vmem_cap = int(pltpu.get_tpu_info().vmem_capacity_bytes)
    except Exception:
        vmem_cap = 64 * 1024 * 1024

    weight_bytes = two_c * four_cp * 2 + four_cp * 4   # bf16 W + f32 bias

    tb = _pick_batch_tile(b_dim, c, cp, weight_bytes, vmem_cap)
    bp = _round_up(b_dim, tb)
    nb = bp // tb

    if bp != b_dim:                      # skip the pad copy when aligned
        x = jnp.pad(x, ((0, bp - b_dim), (0, 0)))
        v = jnp.pad(v, ((0, bp - b_dim), (0, 0)))

    act_spec = pl.BlockSpec((tb, c), lambda i: (i, 0))

    # Rough VMEM bound: double-buffered activation tiles (x, v, spike, v_new),
    # weights/bias (worst-case 2 buffers), z + gate intermediates + headroom.
    vmem_estimate = (4 * 2 * tb * c * 4 + 2 * weight_bytes
                     + 4 * tb * four_cp * 4 + (2 << 20))
    vmem_limit = int(min(max(vmem_estimate, 32 * 1024 * 1024),
                         vmem_cap - 4 * 1024 * 1024))

    flops = 2 * bp * two_c * four_cp + 10 * bp * c
    transcendentals = 4 * bp * c
    bytes_accessed = 4 * 4 * bp * c + 2 * two_c * four_cp + 4 * four_cp

    def build(single_buffer_weights):
        if single_buffer_weights:
            # Constant index_map => one resident buffer is enough; halves the
            # weight VMEM footprint (critical on v7x's 64 MiB VMEM).
            w_spec = pl.BlockSpec((two_c, four_cp), lambda i: (0, 0),
                                  pipeline_mode=pl.Buffered(1))
            b_spec = pl.BlockSpec((1, four_cp), lambda i: (0, 0),
                                  pipeline_mode=pl.Buffered(1))
        else:
            w_spec = pl.BlockSpec((two_c, four_cp), lambda i: (0, 0))
            b_spec = pl.BlockSpec((1, four_cp), lambda i: (0, 0))
        return pl.pallas_call(
            functools.partial(gpn_kernel, c=c, cp=cp),
            grid=(nb,),
            in_specs=[act_spec, act_spec, w_spec, b_spec],
            out_specs=[act_spec, act_spec],
            out_shape=[
                jax.ShapeDtypeStruct((bp, c), x.dtype),
                jax.ShapeDtypeStruct((bp, c), x.dtype),
            ],
            compiler_params=pltpu.CompilerParams(
                dimension_semantics=("parallel",),
                vmem_limit_bytes=vmem_limit),
            cost_estimate=pl.CostEstimate(
                flops=int(flops), transcendentals=int(transcendentals),
                bytes_accessed=int(bytes_accessed)),
        )

    try:
        spike, v_new = build(True)(x, v, w_p, bias_p)
    except Exception:
        # JAX versions without BlockSpec.pipeline_mode: default buffering.
        spike, v_new = build(False)(x, v, w_p, bias_p)

    return spike[:b_dim], v_new[:b_dim]


def gpn_reference(x, v, v_reset, w, bias):
    """Plain-JAX (f32) reference mirroring the PyTorch forward."""
    combined = jnp.concatenate([v, x], axis=1)
    z = combined @ w.T + bias
    cc_f, cc_i, cc_b, cc_t = jnp.split(z, 4, axis=1)
    f = jax.nn.sigmoid(cc_f)
    i = jax.nn.sigmoid(cc_i)
    b = jnp.tanh(cc_b)
    t = jax.nn.sigmoid(cc_t)
    v_hidden = f * v + i * x
    spike = (v_hidden - t >= 0.0).astype(x.dtype)
    v_new = (1.0 - spike) * v_hidden + spike * v_reset + b
    return spike, v_new


if __name__ == "__main__":
    B = 8                 # batch
    C = 32                # input_channels (hidden)
    CP = _round_up(C, LANE)   # per-gate lane-padded width

    key = jax.random.PRNGKey(0)
    kx, kw, kb = jax.random.split(key, 3)

    x = jax.random.normal(kx, (B, C), dtype=jnp.float32)

    # Deterministic nn.Linear(2C -> 4C)-shaped parameters (uniform +-1/sqrt(2C)).
    bound = 1.0 / jnp.sqrt(2.0 * C)
    w = jax.random.uniform(kw, (4 * C, 2 * C), minval=-bound, maxval=bound,
                           dtype=jnp.float32)
    bias = jax.random.uniform(kb, (4 * C,), minval=-bound, maxval=bound,
                              dtype=jnp.float32)

    # One-time parameter preprocessing (hoisted out of the recurrent step).
    w_p, bias_p = gpn_prepare_params(w, bias, C, CP)

    # Eval-mode first call: v_reset = 0, v = v_reset.
    v = jnp.zeros((B, C), jnp.float32)

    spike, v_new = gpn_forward(x, v, w_p, bias_p, C)
    jax.block_until_ready((spike, v_new))

    assert spike.shape == (B, C) and v_new.shape == (B, C)

    spike_ref, vnew_ref = gpn_reference(x, v, jnp.zeros_like(x), w, bias)

    # bf16 matmul operands: validate with a tolerance on the spike mismatch
    # rate (knife-edge thresholds can flip) and on v_new where spikes agree.
    mismatch_rate = float(jnp.mean(jnp.abs(spike - spike_ref)))
    assert mismatch_rate <= 0.02, f"spike mismatch rate {mismatch_rate}"
    agree = spike == spike_ref
    v_err = float(jnp.max(jnp.where(agree, jnp.abs(v_new - vnew_ref), 0.0)))
    assert v_err <= 2e-2, f"v_new max err {v_err}"

    print("KERNEL_OK")
</pallas_src>

<mosaic_0001>
module attributes {stable_mosaic.version = 11 : i64} {
  func.func @gpn_kernel(%arg0: i32, %arg1: memref<8x32xf32, #tpu.memory_space<vmem>>, %arg2: memref<8x32xf32, #tpu.memory_space<vmem>>, %arg3: memref<64x512xbf16, #tpu.memory_space<vmem>>, %arg4: memref<1x512xf32, #tpu.memory_space<vmem>>, %arg5: memref<8x32xf32, #tpu.memory_space<vmem>>, %arg6: memref<8x32xf32, #tpu.memory_space<vmem>>) attributes {dimension_semantics = [#tpu.dimension_semantics<parallel>], iteration_bounds = array<i64: 1>, scalar_prefetch = 0 : i64, scratch_operands = 0 : i64, tpu.core_type = #tpu.core_type<tc>, window_params = [{transform_indices = @transform_0, window_bounds = array<i64: 8, 32>}, {transform_indices = @transform_1, window_bounds = array<i64: 8, 32>}, {pipeline_mode = #tpu.pipeline_mode<synchronous>, transform_indices = @transform_2, window_bounds = array<i64: 64, 512>}, {pipeline_mode = #tpu.pipeline_mode<synchronous>, transform_indices = @transform_3, window_bounds = array<i64: 1, 512>}, {transform_indices = @transform_4, window_bounds = array<i64: 8, 32>}, {transform_indices = @transform_5, window_bounds = array<i64: 8, 32>}]} {
    %c0 = arith.constant 0 : index
    %c0_0 = arith.constant 0 : index
    %0 = vector.load %arg1[%c0, %c0_0] : memref<8x32xf32, #tpu.memory_space<vmem>>, vector<8x32xf32>
    %c0_1 = arith.constant 0 : index
    %c0_2 = arith.constant 0 : index
    %1 = vector.load %arg2[%c0_1, %c0_2] : memref<8x32xf32, #tpu.memory_space<vmem>>, vector<8x32xf32>
    %2 = tpu.concatenate %1, %0 in 1 : vector<8x32xf32>, vector<8x32xf32> -> vector<8x64xf32>
    %3 = arith.truncf %2 : vector<8x64xf32> to vector<8x64xbf16>
    %c0_3 = arith.constant 0 : index
    %c0_4 = arith.constant 0 : index
    %4 = vector.load %arg3[%c0_3, %c0_4] : memref<64x512xbf16, #tpu.memory_space<vmem>>, vector<64x512xbf16>
    %cst = arith.constant dense<0.000000e+00> : vector<8x512xf32>
    %5 = tpu.matmul %3, %4, %cst {dimension_numbers = #tpu.dot_dimension_numbers<[1], [0], [0], [1], [0, 0, 1, 1], [], []>} : vector<8x64xbf16>, vector<64x512xbf16>, vector<8x512xf32> -> vector<8x512xf32>
    %c0_5 = arith.constant 0 : index
    %c0_6 = arith.constant 0 : index
    %6 = vector.load %arg4[%c0_5, %c0_6] : memref<1x512xf32, #tpu.memory_space<vmem>>, vector<1x512xf32>
    %7 = vector.broadcast %6 : vector<1x512xf32> to vector<8x512xf32>
    %8 = arith.addf %5, %7 : vector<8x512xf32>
    %9 = vector.extract_strided_slice %8 {offsets = [0, 0], sizes = [8, 32], strides = [1, 1]} : vector<8x512xf32> to vector<8x32xf32>
    %cst_7 = arith.constant 5.000000e-01 : f32
    %10 = vector.broadcast %cst_7 : f32 to vector<8x32xf32>
    %11 = arith.mulf %10, %9 : vector<8x32xf32>
    %12 = math.tanh %11 : vector<8x32xf32>
    %cst_8 = arith.constant 1.000000e+00 : f32
    %13 = vector.broadcast %cst_8 : f32 to vector<8x32xf32>
    %14 = arith.addf %12, %13 : vector<8x32xf32>
    %cst_9 = arith.constant 5.000000e-01 : f32
    %15 = vector.broadcast %cst_9 : f32 to vector<8x32xf32>
    %16 = arith.mulf %15, %14 : vector<8x32xf32>
    %17 = vector.extract_strided_slice %8 {offsets = [0, 128], sizes = [8, 32], strides = [1, 1]} : vector<8x512xf32> to vector<8x32xf32>
    %cst_10 = arith.constant 5.000000e-01 : f32
    %18 = vector.broadcast %cst_10 : f32 to vector<8x32xf32>
    %19 = arith.mulf %18, %17 : vector<8x32xf32>
    %20 = math.tanh %19 : vector<8x32xf32>
    %cst_11 = arith.constant 1.000000e+00 : f32
    %21 = vector.broadcast %cst_11 : f32 to vector<8x32xf32>
    %22 = arith.addf %20, %21 : vector<8x32xf32>
    %cst_12 = arith.constant 5.000000e-01 : f32
    %23 = vector.broadcast %cst_12 : f32 to vector<8x32xf32>
    %24 = arith.mulf %23, %22 : vector<8x32xf32>
    %25 = vector.extract_strided_slice %8 {offsets = [0, 256], sizes = [8, 32], strides = [1, 1]} : vector<8x512xf32> to vector<8x32xf32>
    %26 = math.tanh %25 : vector<8x32xf32>
    %27 = vector.extract_strided_slice %8 {offsets = [0, 384], sizes = [8, 32], strides = [1, 1]} : vector<8x512xf32> to vector<8x32xf32>
    %cst_13 = arith.constant 5.000000e-01 : f32
    %28 = vector.broadcast %cst_13 : f32 to vector<8x32xf32>
    %29 = arith.mulf %28, %27 : vector<8x32xf32>
    %30 = math.tanh %29 : vector<8x32xf32>
    %cst_14 = arith.constant 1.000000e+00 : f32
    %31 = vector.broadcast %cst_14 : f32 to vector<8x32xf32>
    %32 = arith.addf %30, %31 : vector<8x32xf32>
    %cst_15 = arith.constant 5.000000e-01 : f32
    %33 = vector.broadcast %cst_15 : f32 to vector<8x32xf32>
    %34 = arith.mulf %33, %32 : vector<8x32xf32>
    %35 = arith.mulf %16, %1 : vector<8x32xf32>
    %36 = arith.mulf %24, %0 : vector<8x32xf32>
    %37 = arith.addf %35, %36 : vector<8x32xf32>
    %38 = arith.cmpf oge, %37, %34 : vector<8x32xf32>
    %39 = arith.extui %38 : vector<8x32xi1> to vector<8x32xi32>
    %40 = arith.sitofp %39 : vector<8x32xi32> to vector<8x32xf32>
    %cst_16 = arith.constant 0.000000e+00 : f32
    %41 = vector.broadcast %cst_16 : f32 to vector<8x32xf32>
    %42 = arith.select %38, %41, %37 : vector<8x32xi1>, vector<8x32xf32>
    %43 = arith.addf %42, %26 : vector<8x32xf32>
    %c0_17 = arith.constant 0 : index
    %c0_18 = arith.constant 0 : index
    %44 = vector.load %arg5[%c0_17, %c0_18] : memref<8x32xf32, #tpu.memory_space<vmem>>, vector<8x32xf32>
    tpu.vector_store %arg5[%c0_17, %c0_18], %40 {strides = array<i32>} : memref<8x32xf32, #tpu.memory_space<vmem>>, vector<8x32xf32>,
    %c0_19 = arith.constant 0 : index
    %c0_20 = arith.constant 0 : index
    %45 = vector.load %arg6[%c0_19, %c0_20] : memref<8x32xf32, #tpu.memory_space<vmem>>, vector<8x32xf32>
    tpu.vector_store %arg6[%c0_19, %c0_20], %43 {strides = array<i32>} : memref<8x32xf32, #tpu.memory_space<vmem>>, vector<8x32xf32>,
    return
  }
  func.func @transform_0(%arg0: i32) -> (i32, i32) {
    %c0_i32 = arith.constant 0 : i32
    %c0_i32_0 = arith.constant 0 : i32
    return %arg0, %c0_i32 : i32, i32
  }
  func.func @transform_1(%arg0: i32) -> (i32, i32) {
    %c0_i32 = arith.constant 0 : i32
    %c0_i32_0 = arith.constant 0 : i32
    return %arg0, %c0_i32 : i32, i32
  }
  func.func @transform_2(%arg0: i32) -> (i32, i32) {
    %c0_i32 = arith.constant 0 : i32
    %c0_i32_0 = arith.constant 0 : i32
    %c0_i32_1 = arith.constant 0 : i32
    return %c0_i32, %c0_i32_0 : i32, i32
  }
  func.func @transform_3(%arg0: i32) -> (i32, i32) {
    %c0_i32 = arith.constant 0 : i32
    %c0_i32_0 = arith.constant 0 : i32
    %c0_i32_1 = arith.constant 0 : i32
    return %c0_i32, %c0_i32_0 : i32, i32
  }
  func.func @transform_4(%arg0: i32) -> (i32, i32) {
    %c0_i32 = arith.constant 0 : i32
    %c0_i32_0 = arith.constant 0 : i32
    return %arg0, %c0_i32 : i32, i32
  }
  func.func @transform_5(%arg0: i32) -> (i32, i32) {
    %c0_i32 = arith.constant 0 : i32
    %c0_i32_0 = arith.constant 0 : i32
    return %arg0, %c0_i32 : i32, i32
  }
}

module attributes {stable_mosaic.version = 11 : i64} {
  func.func @gpn_kernel(%arg0: i32, %arg1: memref<8x32xf32, #tpu.memory_space<vmem>>, %arg2: memref<8x32xf32, #tpu.memory_space<vmem>>, %arg3: memref<64x512xbf16, #tpu.memory_space<vmem>>, %arg4: memref<1x512xf32, #tpu.memory_space<vmem>>, %arg5: memref<8x32xf32, #tpu.memory_space<vmem>>, %arg6: memref<8x32xf32, #tpu.memory_space<vmem>>) attributes {dimension_semantics = [#tpu.dimension_semantics<parallel>], iteration_bounds = array<i64: 1>, scalar_prefetch = 0 : i64, scratch_operands = 0 : i64, tpu.core_type = #tpu.core_type<tc>, window_params = [{transform_indices = @transform_0, window_bounds = array<i64: 8, 32>}, {transform_indices = @transform_1, window_bounds = array<i64: 8, 32>}, {pipeline_mode = #tpu.pipeline_mode<synchronous>, transform_indices = @transform_2, window_bounds = array<i64: 64, 512>}, {pipeline_mode = #tpu.pipeline_mode<synchronous>, transform_indices = @transform_3, window_bounds = array<i64: 1, 512>}, {transform_indices = @transform_4, window_bounds = array<i64: 8, 32>}, {transform_indices = @transform_5, window_bounds = array<i64: 8, 32>}]} {
    %c0 = arith.constant 0 : index
    %c0_0 = arith.constant 0 : index
    %0 = vector.load %arg1[%c0, %c0_0] : memref<8x32xf32, #tpu.memory_space<vmem>>, vector<8x32xf32>
    %c0_1 = arith.constant 0 : index
    %c0_2 = arith.constant 0 : index
    %1 = vector.load %arg2[%c0_1, %c0_2] : memref<8x32xf32, #tpu.memory_space<vmem>>, vector<8x32xf32>
    %2 = tpu.concatenate %1, %0 in 1 : vector<8x32xf32>, vector<8x32xf32> -> vector<8x64xf32>
    %3 = arith.truncf %2 : vector<8x64xf32> to vector<8x64xbf16>
    %c0_3 = arith.constant 0 : index
    %c0_4 = arith.constant 0 : index
    %4 = vector.load %arg3[%c0_3, %c0_4] : memref<64x512xbf16, #tpu.memory_space<vmem>>, vector<64x512xbf16>
    %cst = arith.constant dense<0.000000e+00> : vector<8x512xf32>
    %5 = tpu.matmul %3, %4, %cst {dimension_numbers = #tpu.dot_dimension_numbers<[1], [0], [0], [1], [0, 0, 1, 1], [], []>} : vector<8x64xbf16>, vector<64x512xbf16>, vector<8x512xf32> -> vector<8x512xf32>
    %c0_5 = arith.constant 0 : index
    %c0_6 = arith.constant 0 : index
    %6 = vector.load %arg4[%c0_5, %c0_6] : memref<1x512xf32, #tpu.memory_space<vmem>>, vector<1x512xf32>
    %7 = vector.broadcast %6 : vector<1x512xf32> to vector<8x512xf32>
    %8 = arith.addf %5, %7 : vector<8x512xf32>
    %9 = vector.extract_strided_slice %8 {offsets = [0, 0], sizes = [8, 32], strides = [1, 1]} : vector<8x512xf32> to vector<8x32xf32>
    %cst_7 = arith.constant 5.000000e-01 : f32
    %10 = vector.broadcast %cst_7 : f32 to vector<8x32xf32>
    %11 = arith.mulf %10, %9 : vector<8x32xf32>
    %12 = math.tanh %11 : vector<8x32xf32>
    %cst_8 = arith.constant 1.000000e+00 : f32
    %13 = vector.broadcast %cst_8 : f32 to vector<8x32xf32>
    %14 = arith.addf %12, %13 : vector<8x32xf32>
    %cst_9 = arith.constant 5.000000e-01 : f32
    %15 = vector.broadcast %cst_9 : f32 to vector<8x32xf32>
    %16 = arith.mulf %15, %14 : vector<8x32xf32>
    %17 = vector.extract_strided_slice %8 {offsets = [0, 128], sizes = [8, 32], strides = [1, 1]} : vector<8x512xf32> to vector<8x32xf32>
    %cst_10 = arith.constant 5.000000e-01 : f32
    %18 = vector.broadcast %cst_10 : f32 to vector<8x32xf32>
    %19 = arith.mulf %18, %17 : vector<8x32xf32>
    %20 = math.tanh %19 : vector<8x32xf32>
    %cst_11 = arith.constant 1.000000e+00 : f32
    %21 = vector.broadcast %cst_11 : f32 to vector<8x32xf32>
    %22 = arith.addf %20, %21 : vector<8x32xf32>
    %cst_12 = arith.constant 5.000000e-01 : f32
    %23 = vector.broadcast %cst_12 : f32 to vector<8x32xf32>
    %24 = arith.mulf %23, %22 : vector<8x32xf32>
    %25 = vector.extract_strided_slice %8 {offsets = [0, 256], sizes = [8, 32], strides = [1, 1]} : vector<8x512xf32> to vector<8x32xf32>
    %26 = math.tanh %25 : vector<8x32xf32>
    %27 = vector.extract_strided_slice %8 {offsets = [0, 384], sizes = [8, 32], strides = [1, 1]} : vector<8x512xf32> to vector<8x32xf32>
    %cst_13 = arith.constant 5.000000e-01 : f32
    %28 = vector.broadcast %cst_13 : f32 to vector<8x32xf32>
    %29 = arith.mulf %28, %27 : vector<8x32xf32>
    %30 = math.tanh %29 : vector<8x32xf32>
    %cst_14 = arith.constant 1.000000e+00 : f32
    %31 = vector.broadcast %cst_14 : f32 to vector<8x32xf32>
    %32 = arith.addf %30, %31 : vector<8x32xf32>
    %cst_15 = arith.constant 5.000000e-01 : f32
    %33 = vector.broadcast %cst_15 : f32 to vector<8x32xf32>
    %34 = arith.mulf %33, %32 : vector<8x32xf32>
    %35 = arith.mulf %16, %1 : vector<8x32xf32>
    %36 = arith.mulf %24, %0 : vector<8x32xf32>
    %37 = arith.addf %35, %36 : vector<8x32xf32>
    %38 = arith.cmpf oge, %37, %34 : vector<8x32xf32>
    %39 = arith.extui %38 : vector<8x32xi1> to vector<8x32xi32>
    %40 = arith.sitofp %39 : vector<8x32xi32> to vector<8x32xf32>
    %cst_16 = arith.constant 0.000000e+00 : f32
    %41 = vector.broadcast %cst_16 : f32 to vector<8x32xf32>
    %42 = arith.select %38, %41, %37 : vector<8x32xi1>, vector<8x32xf32>
    %43 = arith.addf %42, %26 : vector<8x32xf32>
    %c0_17 = arith.constant 0 : index
    %c0_18 = arith.constant 0 : index
    %44 = vector.load %arg5[%c0_17, %c0_18] : memref<8x32xf32, #tpu.memory_space<vmem>>, vector<8x32xf32>
    tpu.vector_store %arg5[%c0_17, %c0_18], %40 {strides = array<i32>} : memref<8x32xf32, #tpu.memory_space<vmem>>, vector<8x32xf32>,
    %c0_19 = arith.constant 0 : index
    %c0_20 = arith.constant 0 : index
    %45 = vector.load %arg6[%c0_19, %c0_20] : memref<8x32xf32, #tpu.memory_space<vmem>>, vector<8x32xf32>
    tpu.vector_store %arg6[%c0_19, %c0_20], %43 {strides = array<i32>} : memref<8x32xf32, #tpu.memory_space<vmem>>, vector<8x32xf32>,
    return
  }
  func.func @transform_0(%arg0: i32) -> (i32, i32) {
    %c0_i32 = arith.constant 0 : i32
    %c0_i32_0 = arith.constant 0 : i32
    return %arg0, %c0_i32 : i32, i32
  }
  func.func @transform_1(%arg0: i32) -> (i32, i32) {
    %c0_i32 = arith.constant 0 : i32
    %c0_i32_0 = arith.constant 0 : i32
    return %arg0, %c0_i32 : i32, i32
  }
  func.func @transform_2(%arg0: i32) -> (i32, i32) {
    %c0_i32 = arith.constant 0 : i32
    %c0_i32_0 = arith.constant 0 : i32
    %c0_i32_1 = arith.constant 0 : i32
    return %c0_i32, %c0_i32_0 : i32, i32
  }
  func.func @transform_3(%arg0: i32) -> (i32, i32) {
    %c0_i32 = arith.constant 0 : i32
    %c0_i32_0 = arith.constant 0 : i32
    %c0_i32_1 = arith.constant 0 : i32
    return %c0_i32, %c0_i32_0 : i32, i32
  }
  func.func @transform_4(%arg0: i32) -> (i32, i32) {
    %c0_i32 = arith.constant 0 : i32
    %c0_i32_0 = arith.constant 0 : i32
    return %arg0, %c0_i32 : i32, i32
  }
  func.func @transform_5(%arg0: i32) -> (i32, i32) {
    %c0_i32 = arith.constant 0 : i32
    %c0_i32_0 = arith.constant 0 : i32
    return %arg0, %c0_i32 : i32, i32
  }
}

</mosaic_0001>

<bundles_post_ra>
// kernel: tpu_custom_call.1
= control target key start
LH: loop header
LB: loop body
LE: loop exit
PB: predicated region body
PF: predicated region fallthrough
CT: control target
= control target key end

     0   :  { %11 = vsyncpa [#allocation3], 0  ;;  %s614_s0 = inlined_call_operand.hbm [shape: f32[8,32], index: 0, kind: input, shape index: {}]   ;;  %s615_s1 = inlined_call_operand.hbm [shape: f32[8,32], index: 1, kind: input, shape index: {}]   ;;  %s616_s2 = inlined_call_operand.hbm [shape: bf16[64,512], index: 2, kind: input, shape index: {}]   ;;  %s617_s3 = inlined_call_operand.vmem [shape: f32[1,512], index: 3, kind: input, shape index: {}]   ;;  %s618_s4 = inlined_call_operand.hbm [shape: f32[8,32], index: 4, kind: output, shape index: {0}]   ;;  %s619_s5 = inlined_call_operand.hbm [shape: f32[8,32], index: 5, kind: output, shape index: {1}]  }
   0x1   :  { %12 = vsyncpa [#allocation6], 0 }
   0x2   :  { %13 = vsyncpa [#allocation4], 0 }
   0x3   :  { %14 = vsyncpa [#allocation10], 0  ;;  %s504_s18 = smov [#allocation5]   ;;  %s505_s20 = smov [#allocation2]  }
   0x4   :  { %s31_s19 = sshll.u32 %s504_s18, 4  ;;  %s21_s21 = sshll.u32 %s505_s20, 4  ;;  %s32_s19 = int_to_ptr.vmem [resolvable:$true] %s31_s19  ;;  %s22_s21 = int_to_ptr.vmem [resolvable:$true] %s21_s21 }
   0x5   :  { %s386_s24 = scalar_lea.hbm %s615_s1, 128 }
   0x6   :  { %p387_p0 = scmp.ne.s32.totalorder %s615_s1, %s386_s24  ;;  %p390_p1 = scmp.lt.u32.totalorder %s386_s24, %s615_s1 }
   0x8   :  { %p392_p2 = pnand %p390_p1, %p387_p0 }
   0xa   :  { %395 = shalt.err (!%p392_p2)
}
   0xb   :  { %s396_s29 = scalar_lea.vmem %s32_s19, 128  ;;  %p401_p4 = scmp.lt.s32.totalorder %s32_s19, %s32_s19 }
   0xc   :  { %p397_p3 = scmp.ne.s32.totalorder %s32_s19, %s396_s29  ;;  %p402_p5 = scmp.lt.s32.totalorder %s396_s29, %s396_s29 }
   0xe   :  { %p403_p6 = por %p402_p5, %p401_p4 }
  0x10   :  { %p404_p7 = pnand %p403_p6, %p397_p3 }
  0x12   :  { %407 = shalt.err (!%p404_p7)
}
  0x13   :  { %34 = dma.hbm_to_vmem [thread:$0]  %s615_s1, 128, %s32_s19, [#allocation6]  }
  0x14   :  { %s408_s9 = scalar_lea.hbm %s614_s0, 128 }
  0x15   :  { %p409_p8 = scmp.ne.s32.totalorder %s614_s0, %s408_s9  ;;  %p412_p9 = scmp.lt.u32.totalorder %s408_s9, %s614_s0 }
  0x17   :  { %p414_p10 = pnand %p412_p9, %p409_p8 }
  0x19   :  { %417 = shalt.err (!%p414_p10)
}
  0x1a   :  { %s418_s14 = scalar_lea.vmem %s22_s21, 128  ;;  %p423_p12 = scmp.lt.s32.totalorder %s22_s21, %s22_s21 }
  0x1b   :  { %p419_p11 = scmp.ne.s32.totalorder %s22_s21, %s418_s14  ;;  %p424_p13 = scmp.lt.s32.totalorder %s418_s14, %s418_s14 }
  0x1d   :  { %p425_p0 = por %p424_p13, %p423_p12 }
  0x1f   :  { %p426_p1 = pnand %p425_p0, %p419_p11 }
  0x21   :  { %429 = shalt.err (!%p426_p1)
}
  0x22   :  { %24 = dma.hbm_to_vmem [thread:$0]  %s614_s0, 128, %s22_s21, [#allocation3]  }
  0x23   :  { %s506_s16 = smov [#allocation7]   ;;  %s430_s20 = scalar_lea.hbm %s616_s2, 2048 }
  0x24   :  { %s40_s17 = sshll.u32 %s506_s16, 4  ;;  %p431_p2 = scmp.ne.s32.totalorder %s616_s2, %s430_s20  ;;  %s41_s17 = int_to_ptr.vmem [resolvable:$true] %s40_s17 }
  0x25   :  { %p434_p3 = scmp.lt.u32.totalorder %s430_s20, %s616_s2 }
  0x27   :  { %p436_p4 = pnand %p434_p3, %p431_p2 }
  0x29   :  { %439 = shalt.err (!%p436_p4)
}
  0x2a   :  { %s440_s26 = scalar_lea.vmem %s41_s17, 2048  ;;  %p445_p6 = scmp.lt.s32.totalorder %s41_s17, %s41_s17 }
  0x2b   :  { %p441_p5 = scmp.ne.s32.totalorder %s41_s17, %s440_s26  ;;  %p446_p7 = scmp.lt.s32.totalorder %s440_s26, %s440_s26 }
  0x2d   :  { %p447_p8 = por %p446_p7, %p445_p6 }
  0x2f   :  { %p448_p9 = pnand %p447_p8, %p441_p5 }
  0x31   :  { %451 = shalt.err (!%p448_p9)
}
  0x32   :  { %s507_s0 = smov 256   ;;  %s508_s21 = smov 16  }
  0x33   :  { %46 = dma.hbm_to_vmem [thread:$0]  %s616_s2, 2048, %s41_s17, [#allocation6], %s507_s0, %s507_s0, %s508_s21  }
  0x34   :  { %496 = dma.done.wait [#allocation3], 128  }
  0x35   :  { %497 = vsyncadd [#allocation3], 4294967168 }
  0x36   :  { %498 = dma.done.wait [#allocation6], 2176  }
  0x37   :  { %499 = vsyncadd [#allocation6], 4294965120  ;;  %v509_v0 = vmov 0   ;;  %v580_v1 = vld [vmem:[#allocation2] sm:$0xff]  ;;  %s510_s29 = smov 32   ;;  %v60_v18 = vld [vmem:[#allocation5] sm:$0xff]  ;;  %v86_v22 = vlaneseq }
  0x38   :  { %222 = vmatprep.mubr.bf16.mxu0 %v509_v0  ;;  %263 = vmatprep.mubr.bf16.mxu1 %v509_v0  ;;  %v354_v2 = vld [vmem:[#allocation7 + $0x4] ss:$16 sps:$4 sm:$0xff]   ;;  %v356_v3 = vld [vmem:[#allocation7 + $0xc] ss:$16 sps:$4 sm:$0xff]   ;;  %v358_v4 = vld [vmem:[#allocation7] ss:$16 sps:$4 sm:$0xff]  }
  0x39   :  { %62 = vrot.lane.b32.xlu0 %v580_v1, %s510_s29  ;;  %v359_v5 = vld [vmem:[#allocation7 + $0x8] ss:$16 sps:$4 sm:$0xff]   ;;  %190 = vmatprep.subr.bf16.mxu0 %v354_v2  ;;  %v360_v6 = vld [vmem:[#allocation7 + $0x24] ss:$16 sps:$4 sm:$0xff]   ;;  %v362_v7 = vld [vmem:[#allocation7 + $0x2c] ss:$16 sps:$4 sm:$0xff]  }
  0x3a   :  { %231 = vmatprep.subr.bf16.mxu1 %v356_v3  ;;  %191 = vmatpush1.bf16.msra.mxu0 %v358_v4  ;;  %v364_v8 = vld [vmem:[#allocation7 + $0x20] ss:$16 sps:$4 sm:$0xff]   ;;  %v365_v9 = vld [vmem:[#allocation7 + $0x28] ss:$16 sps:$4 sm:$0xff]   ;;  %v366_v10 = vld [vmem:[#allocation7 + $0x44] ss:$16 sps:$4 sm:$0xff]  }
  0x3b   :  { %232 = vmatpush1.bf16.msra.mxu1 %v359_v5  ;;  %192 = vmatprep.subr.bf16.mxu0 %v360_v6  ;;  %v368_v11 = vld [vmem:[#allocation7 + $0x4c] ss:$16 sps:$4 sm:$0xff]   ;;  %v370_v12 = vld [vmem:[#allocation7 + $0x40] ss:$16 sps:$4 sm:$0xff]   ;;  %v371_v13 = vld [vmem:[#allocation7 + $0x48] ss:$16 sps:$4 sm:$0xff]  }
  0x3c   :  { %233 = vmatprep.subr.bf16.mxu1 %v362_v7  ;;  %v372_v14 = vld [vmem:[#allocation7 + $0x64] ss:$16 sps:$4 sm:$0xff]   ;;  %v374_v15 = vld [vmem:[#allocation7 + $0x6c] ss:$16 sps:$4 sm:$0xff]   ;;  %v376_v16 = vld [vmem:[#allocation7 + $0x60] ss:$16 sps:$4 sm:$0xff]  }
  0x3d   :  { %v377_v17 = vld [vmem:[#allocation7 + $0x68] ss:$16 sps:$4 sm:$0xff]   ;;  %vm65_vm0 = vcmask 261120   ;;  %vm186_vm1 = vcmask 523264   ;;  %v87_v23 = vshrl.u32 %v86_v22, 7  ;;  %s512_s7 = smov [#allocation9]  }
  0x3e   :  { %193 = vmatpush1.bf16.msra.mxu0 %v364_v8  ;;  %v84_v25 = vld [vmem:[%s617_s3] sm:$0xf]  ;;  %s511_s3 = smov [#allocation8]   ;;  %s311_s8 = sshll.u32 %s512_s7, 4  ;;  %v513_v61 = vmov 0.0   ;;  %s312_s8 = int_to_ptr.vmem [resolvable:$true] %s311_s8 }
  0x3f   :  { %234 = vmatpush1.bf16.msra.mxu1 %v365_v9  ;;  %194 = vmatprep.subr.bf16.mxu0 %v366_v10  ;;  %v88_v24 = vsub.s32 0, %v87_v23  ;;  %v92_v26 = vsub.s32 1, %v87_v23  ;;  %v100_v27 = vsub.s32 3, %v87_v23  ;;  %v96_v43 = vsub.s32 2, %v87_v23  ;;  %s301_s6 = sshll.u32 %s511_s3, 4  ;;  %s302_s6 = int_to_ptr.vmem [resolvable:$true] %s301_s6 }
  0x40   :  { %235 = vmatprep.subr.bf16.mxu1 %v368_v11  ;;  %s452_s9 = scalar_lea.vmem %s302_s6, 128  ;;  %p457_p11 = scmp.lt.s32.totalorder %s302_s6, %s302_s6 }
  0x41   :  { %v89_v28 = vrot.slane %v84_v25, %v88_v24  ;;  %v93_v29 = vrot.slane %v84_v25, %v92_v26  ;;  %v101_v30 = vrot.slane %v84_v25, %v100_v27  ;;  %v97_v46 = vrot.slane %v84_v25, %v96_v43  ;;  %p453_p10 = scmp.ne.s32.totalorder %s302_s6, %s452_s9  ;;  %p458_p12 = scmp.lt.s32.totalorder %s452_s9, %s452_s9 }
  0x42   :  { %195 = vmatpush1.bf16.msra.mxu0 %v370_v12 }
  0x43   :  { %236 = vmatpush1.bf16.msra.mxu1 %v371_v13  ;;  %196 = vmatprep.subr.bf16.mxu0 %v372_v14  ;;  %p459_p13 = por %p458_p12, %p457_p11 }
  0x44   :  { %237 = vmatprep.subr.bf16.mxu1 %v374_v15 }
  0x45   :  { %p460_p0 = pnand %p459_p13, %p453_p10 }
  0x46   :  { %197 = vmatpush1.bf16.msra.mxu0 %v376_v16 }
  0x47   :  { %238 = vmatpush1.bf16.msra.mxu1 %v377_v17 }
  0xab   :  { %v63_v19 = vpop.permute.xlu0 %62 }
  0xac   :  { %v66_v20 = vsel %vm65_vm0, %v60_v18, %v63_v19 }
  0xad   :  { %v67_v21 = vpack.c.bf16 %v66_v20, %v66_v20 }
  0xaf   :  { %341 = vmatmul.mubr.msk.bf16.vlgmr.msra.gmra.mrb[0].mxu0 %vm186_vm1, %v67_v21  ;;  %342 = vmatmul.mubr.msk.bf16.vlgmr.msra.gmra.mrb[0].mxu1 %vm186_vm1, %v67_v21 }
 0x182   :  { %v224_v31 = vpop.f32.mrb[0].mxu0  ;;  %v265_v32 = vpop.f32.mrb[0].mxu1 }
 0x183   :  { %v225_v33 = vadd.f32 %v224_v31, %v89_v28  ;;  %v226_v34 = vpop.f32.mrb[1].mxu0  ;;  %v267_v35 = vpop.f32.mrb[1].mxu1  ;;  %v266_v47 = vadd.f32 %v265_v32, %v97_v46 }
 0x184   :  { %v227_v36 = vadd.f32 %v226_v34, %v93_v29  ;;  %v268_v37 = vadd.f32 %v267_v35, %v101_v30  ;;  %v228_v38 = vpop.f32.mrb[2].mxu0  ;;  %v269_v39 = vpop.f32.mrb[2].mxu1 }
 0x185   :  { %v272_v40 = vmul.f32 0.5, %v225_v33  ;;  %v229_v41 = vpop.f32.mrb[3].mxu0  ;;  %v270_v42 = vpop.f32.mrb[3].mxu1 }
 0x186   :  { %v276_v44 = vmul.f32 0.5, %v227_v36  ;;  %v281_v45 = vmul.f32 0.5, %v268_v37 }
 0x187   :  { %378 = vtanh.f32 %v272_v40 }
 0x188   :  { %380 = vtanh.f32 %v276_v44 }
 0x189   :  { %382 = vtanh.f32 %v281_v45 }
 0x18a   :  { %384 = vtanh.f32 %v266_v47 }
 0x191   :  { %v379_v48 = vpop.eup %378 }
 0x192   :  { %v381_v49 = vpop.eup %380  ;;  %v274_v50 = vadd.f32 1.0, %v379_v48 }
 0x193   :  { %v383_v51 = vpop.eup %382  ;;  %v278_v52 = vadd.f32 1.0, %v381_v49 }
 0x194   :  { %v275_v53 = vmul.f32 0.5, %v274_v50  ;;  %v283_v55 = vadd.f32 1.0, %v383_v51  ;;  %v385_v60 = vpop.eup %384 }
 0x195   :  { %v279_v54 = vmul.f32 0.5, %v278_v52 }
 0x196   :  { %v285_v56 = vmul.f32 %v275_v53, %v60_v18  ;;  %v284_v58 = vmul.f32 0.5, %v283_v55 }
 0x197   :  { %v286_v57 = vmul.f32 %v279_v54, %v580_v1 }
 0x199   :  { %v287_v59 = vadd.f32 %v286_v57, %v285_v56 }
 0x19b   :  { %vm288_vm2 = vcmp.ge.f32.partialorder %v287_v59, %v284_v58 }
 0x19c   :  { %v343_v62 = vsel %vm288_vm2, 1.0, %v513_v61  ;;  %v291_v63 = vsel %vm288_vm2, 0.0, %v287_v59 }
 0x19d   :  { %293 = vst.msk [vmem:[#allocation8] sm:$0xff] %vm65_vm0, %v343_v62  ;;  %v292_v0 = vadd.f32 %v385_v60, %v291_v63 }
 0x19e   :  { %463 = shalt.err (!%p460_p0)
}
 0x19f   :  { %s464_s12 = scalar_lea.hbm %s618_s4, 128 }
 0x1a0   :  { %p465_p1 = scmp.ne.s32.totalorder %s618_s4, %s464_s12  ;;  %p468_p2 = scmp.lt.u32.totalorder %s464_s12, %s618_s4 }
 0x1a2   :  { %p470_p3 = pnand %p468_p2, %p465_p1 }
 0x1a4   :  { %473 = shalt.err (!%p470_p3)
}
 0x1a5   :  { %304 = dma.vmem_to_hbm [thread:$0]  %s302_s6, 128, %s618_s4, [#allocation4]   ;;  %294 = vst.msk [vmem:[#allocation9] sm:$0xff] %vm65_vm0, %v292_v0 }
 0x1a6   :  { %s474_s18 = scalar_lea.vmem %s312_s8, 128  ;;  %p479_p5 = scmp.lt.s32.totalorder %s312_s8, %s312_s8 }
 0x1a7   :  { %p475_p4 = scmp.ne.s32.totalorder %s312_s8, %s474_s18  ;;  %p480_p6 = scmp.lt.s32.totalorder %s474_s18, %s474_s18 }
 0x1a9   :  { %p481_p7 = por %p480_p6, %p479_p5 }
 0x1ab   :  { %p482_p8 = pnand %p481_p7, %p475_p4 }
 0x1ad   :  { %485 = shalt.err (!%p482_p8)
}
 0x1ae   :  { %s486_s22 = scalar_lea.hbm %s619_s5, 128 }
 0x1af   :  { %p487_p9 = scmp.ne.s32.totalorder %s619_s5, %s486_s22  ;;  %p490_p10 = scmp.lt.u32.totalorder %s486_s22, %s619_s5 }
 0x1b1   :  { %p492_p11 = pnand %p490_p10, %p487_p9 }
 0x1b3   :  { %495 = shalt.err (!%p492_p11)
}
 0x1b4   :  { %314 = dma.vmem_to_hbm [thread:$0]  %s312_s8, 128, %s619_s5, [#allocation10]  }
 0x1b5   :  { %500 = dma.done.wait [#allocation4], 128  }
 0x1b6   :  { %501 = vsyncadd [#allocation4], 4294967168 }
 0x1b7   :  { %502 = dma.done.wait [#allocation10], 128  }
 0x1b8   :  { %503 = vsyncadd [#allocation10], 4294967168 }
 0x1b9   :  { %321 = vsyncpa [#allocation3], 1 }
 0x1ba   :  { %322 = vsyncpa [#allocation6], 1 }
 0x1bb   :  { %323 = vsyncpa [#allocation4], 1 }
 0x1bc   :  { %324 = vsyncpa [#allocation10], 1 }

// kernel: tpu_custom_call.1
= control target key start
LH: loop header
LB: loop body
LE: loop exit
PB: predicated region body
PF: predicated region fallthrough
CT: control target
= control target key end

     0   :  { %11 = vsyncpa [#allocation3], 0  ;;  %s614_s0 = inlined_call_operand.hbm [shape: f32[8,32], index: 0, kind: input, shape index: {}]   ;;  %s615_s1 = inlined_call_operand.hbm [shape: f32[8,32], index: 1, kind: input, shape index: {}]   ;;  %s616_s2 = inlined_call_operand.hbm [shape: bf16[64,512], index: 2, kind: input, shape index: {}]   ;;  %s617_s3 = inlined_call_operand.vmem [shape: f32[1,512], index: 3, kind: input, shape index: {}]   ;;  %s618_s4 = inlined_call_operand.hbm [shape: f32[8,32], index: 4, kind: output, shape index: {0}]   ;;  %s619_s5 = inlined_call_operand.hbm [shape: f32[8,32], index: 5, kind: output, shape index: {1}]  }
   0x1   :  { %12 = vsyncpa [#allocation6], 0 }
   0x2   :  { %13 = vsyncpa [#allocation4], 0 }
   0x3   :  { %14 = vsyncpa [#allocation10], 0  ;;  %s504_s18 = smov [#allocation5]   ;;  %s505_s20 = smov [#allocation2]  }
   0x4   :  { %s31_s19 = sshll.u32 %s504_s18, 4  ;;  %s21_s21 = sshll.u32 %s505_s20, 4  ;;  %s32_s19 = int_to_ptr.vmem [resolvable:$true] %s31_s19  ;;  %s22_s21 = int_to_ptr.vmem [resolvable:$true] %s21_s21 }
   0x5   :  { %s386_s24 = scalar_lea.hbm %s615_s1, 128 }
   0x6   :  { %p387_p0 = scmp.ne.s32.totalorder %s615_s1, %s386_s24  ;;  %p390_p1 = scmp.lt.u32.totalorder %s386_s24, %s615_s1 }
   0x8   :  { %p392_p2 = pnand %p390_p1, %p387_p0 }
   0xa   :  { %395 = shalt.err (!%p392_p2)
}
   0xb   :  { %s396_s29 = scalar_lea.vmem %s32_s19, 128  ;;  %p401_p4 = scmp.lt.s32.totalorder %s32_s19, %s32_s19 }
   0xc   :  { %p397_p3 = scmp.ne.s32.totalorder %s32_s19, %s396_s29  ;;  %p402_p5 = scmp.lt.s32.totalorder %s396_s29, %s396_s29 }
   0xe   :  { %p403_p6 = por %p402_p5, %p401_p4 }
  0x10   :  { %p404_p7 = pnand %p403_p6, %p397_p3 }
  0x12   :  { %407 = shalt.err (!%p404_p7)
}
  0x13   :  { %34 = dma.hbm_to_vmem [thread:$0]  %s615_s1, 128, %s32_s19, [#allocation6]  }
  0x14   :  { %s408_s9 = scalar_lea.hbm %s614_s0, 128 }
  0x15   :  { %p409_p8 = scmp.ne.s32.totalorder %s614_s0, %s408_s9  ;;  %p412_p9 = scmp.lt.u32.totalorder %s408_s9, %s614_s0 }
  0x17   :  { %p414_p10 = pnand %p412_p9, %p409_p8 }
  0x19   :  { %417 = shalt.err (!%p414_p10)
}
  0x1a   :  { %s418_s14 = scalar_lea.vmem %s22_s21, 128  ;;  %p423_p12 = scmp.lt.s32.totalorder %s22_s21, %s22_s21 }
  0x1b   :  { %p419_p11 = scmp.ne.s32.totalorder %s22_s21, %s418_s14  ;;  %p424_p13 = scmp.lt.s32.totalorder %s418_s14, %s418_s14 }
  0x1d   :  { %p425_p0 = por %p424_p13, %p423_p12 }
  0x1f   :  { %p426_p1 = pnand %p425_p0, %p419_p11 }
  0x21   :  { %429 = shalt.err (!%p426_p1)
}
  0x22   :  { %24 = dma.hbm_to_vmem [thread:$0]  %s614_s0, 128, %s22_s21, [#allocation3]  }
  0x23   :  { %s506_s16 = smov [#allocation7]   ;;  %s430_s20 = scalar_lea.hbm %s616_s2, 2048 }
  0x24   :  { %s40_s17 = sshll.u32 %s506_s16, 4  ;;  %p431_p2 = scmp.ne.s32.totalorder %s616_s2, %s430_s20  ;;  %s41_s17 = int_to_ptr.vmem [resolvable:$true] %s40_s17 }
  0x25   :  { %p434_p3 = scmp.lt.u32.totalorder %s430_s20, %s616_s2 }
  0x27   :  { %p436_p4 = pnand %p434_p3, %p431_p2 }
  0x29   :  { %439 = shalt.err (!%p436_p4)
}
  0x2a   :  { %s440_s26 = scalar_lea.vmem %s41_s17, 2048  ;;  %p445_p6 = scmp.lt.s32.totalorder %s41_s17, %s41_s17 }
  0x2b   :  { %p441_p5 = scmp.ne.s32.totalorder %s41_s17, %s440_s26  ;;  %p446_p7 = scmp.lt.s32.totalorder %s440_s26, %s440_s26 }
  0x2d   :  { %p447_p8 = por %p446_p7, %p445_p6 }
  0x2f   :  { %p448_p9 = pnand %p447_p8, %p441_p5 }
  0x31   :  { %451 = shalt.err (!%p448_p9)
}
  0x32   :  { %s507_s0 = smov 256   ;;  %s508_s21 = smov 16  }
  0x33   :  { %46 = dma.hbm_to_vmem [thread:$0]  %s616_s2, 2048, %s41_s17, [#allocation6], %s507_s0, %s507_s0, %s508_s21  }
  0x34   :  { %496 = dma.done.wait [#allocation3], 128  }
  0x35   :  { %497 = vsyncadd [#allocation3], 4294967168 }
  0x36   :  { %498 = dma.done.wait [#allocation6], 2176  }
  0x37   :  { %499 = vsyncadd [#allocation6], 4294965120  ;;  %v509_v0 = vmov 0   ;;  %v580_v1 = vld [vmem:[#allocation2] sm:$0xff]  ;;  %s510_s29 = smov 32   ;;  %v60_v18 = vld [vmem:[#allocation5] sm:$0xff]  ;;  %v86_v22 = vlaneseq }
  0x38   :  { %222 = vmatprep.mubr.bf16.mxu0 %v509_v0  ;;  %263 = vmatprep.mubr.bf16.mxu1 %v509_v0  ;;  %v354_v2 = vld [vmem:[#allocation7 + $0x4] ss:$16 sps:$4 sm:$0xff]   ;;  %v356_v3 = vld [vmem:[#allocation7 + $0xc] ss:$16 sps:$4 sm:$0xff]   ;;  %v358_v4 = vld [vmem:[#allocation7] ss:$16 sps:$4 sm:$0xff]  }
  0x39   :  { %62 = vrot.lane.b32.xlu0 %v580_v1, %s510_s29  ;;  %v359_v5 = vld [vmem:[#allocation7 + $0x8] ss:$16 sps:$4 sm:$0xff]   ;;  %190 = vmatprep.subr.bf16.mxu0 %v354_v2  ;;  %v360_v6 = vld [vmem:[#allocation7 + $0x24] ss:$16 sps:$4 sm:$0xff]   ;;  %v362_v7 = vld [vmem:[#allocation7 + $0x2c] ss:$16 sps:$4 sm:$0xff]  }
  0x3a   :  { %231 = vmatprep.subr.bf16.mxu1 %v356_v3  ;;  %191 = vmatpush1.bf16.msra.mxu0 %v358_v4  ;;  %v364_v8 = vld [vmem:[#allocation7 + $0x20] ss:$16 sps:$4 sm:$0xff]   ;;  %v365_v9 = vld [vmem:[#allocation7 + $0x28] ss:$16 sps:$4 sm:$0xff]   ;;  %v366_v10 = vld [vmem:[#allocation7 + $0x44] ss:$16 sps:$4 sm:$0xff]  }
  0x3b   :  { %232 = vmatpush1.bf16.msra.mxu1 %v359_v5  ;;  %192 = vmatprep.subr.bf16.mxu0 %v360_v6  ;;  %v368_v11 = vld [vmem:[#allocation7 + $0x4c] ss:$16 sps:$4 sm:$0xff]   ;;  %v370_v12 = vld [vmem:[#allocation7 + $0x40] ss:$16 sps:$4 sm:$0xff]   ;;  %v371_v13 = vld [vmem:[#allocation7 + $0x48] ss:$16 sps:$4 sm:$0xff]  }
  0x3c   :  { %233 = vmatprep.subr.bf16.mxu1 %v362_v7  ;;  %v372_v14 = vld [vmem:[#allocation7 + $0x64] ss:$16 sps:$4 sm:$0xff]   ;;  %v374_v15 = vld [vmem:[#allocation7 + $0x6c] ss:$16 sps:$4 sm:$0xff]   ;;  %v376_v16 = vld [vmem:[#allocation7 + $0x60] ss:$16 sps:$4 sm:$0xff]  }
  0x3d   :  { %v377_v17 = vld [vmem:[#allocation7 + $0x68] ss:$16 sps:$4 sm:$0xff]   ;;  %vm65_vm0 = vcmask 261120   ;;  %vm186_vm1 = vcmask 523264   ;;  %v87_v23 = vshrl.u32 %v86_v22, 7  ;;  %s512_s7 = smov [#allocation9]  }
  0x3e   :  { %193 = vmatpush1.bf16.msra.mxu0 %v364_v8  ;;  %v84_v25 = vld [vmem:[%s617_s3] sm:$0xf]  ;;  %s511_s3 = smov [#allocation8]   ;;  %s311_s8 = sshll.u32 %s512_s7, 4  ;;  %v513_v61 = vmov 0.0   ;;  %s312_s8 = int_to_ptr.vmem [resolvable:$true] %s311_s8 }
  0x3f   :  { %234 = vmatpush1.bf16.msra.mxu1 %v365_v9  ;;  %194 = vmatprep.subr.bf16.mxu0 %v366_v10  ;;  %v88_v24 = vsub.s32 0, %v87_v23  ;;  %v92_v26 = vsub.s32 1, %v87_v23  ;;  %v100_v27 = vsub.s32 3, %v87_v23  ;;  %v96_v43 = vsub.s32 2, %v87_v23  ;;  %s301_s6 = sshll.u32 %s511_s3, 4  ;;  %s302_s6 = int_to_ptr.vmem [resolvable:$true] %s301_s6 }
  0x40   :  { %235 = vmatprep.subr.bf16.mxu1 %v368_v11  ;;  %s452_s9 = scalar_lea.vmem %s302_s6, 128  ;;  %p457_p11 = scmp.lt.s32.totalorder %s302_s6, %s302_s6 }
  0x41   :  { %v89_v28 = vrot.slane %v84_v25, %v88_v24  ;;  %v93_v29 = vrot.slane %v84_v25, %v92_v26  ;;  %v101_v30 = vrot.slane %v84_v25, %v100_v27  ;;  %v97_v46 = vrot.slane %v84_v25, %v96_v43  ;;  %p453_p10 = scmp.ne.s32.totalorder %s302_s6, %s452_s9  ;;  %p458_p12 = scmp.lt.s32.totalorder %s452_s9, %s452_s9 }
  0x42   :  { %195 = vmatpush1.bf16.msra.mxu0 %v370_v12 }
  0x43   :  { %236 = vmatpush1.bf16.msra.mxu1 %v371_v13  ;;  %196 = vmatprep.subr.bf16.mxu0 %v372_v14  ;;  %p459_p13 = por %p458_p12, %p457_p11 }
  0x44   :  { %237 = vmatprep.subr.bf16.mxu1 %v374_v15 }
  0x45   :  { %p460_p0 = pnand %p459_p13, %p453_p10 }
  0x46   :  { %197 = vmatpush1.bf16.msra.mxu0 %v376_v16 }
  0x47   :  { %238 = vmatpush1.bf16.msra.mxu1 %v377_v17 }
  0xab   :  { %v63_v19 = vpop.permute.xlu0 %62 }
  0xac   :  { %v66_v20 = vsel %vm65_vm0, %v60_v18, %v63_v19 }
  0xad   :  { %v67_v21 = vpack.c.bf16 %v66_v20, %v66_v20 }
  0xaf   :  { %341 = vmatmul.mubr.msk.bf16.vlgmr.msra.gmra.mrb[0].mxu0 %vm186_vm1, %v67_v21  ;;  %342 = vmatmul.mubr.msk.bf16.vlgmr.msra.gmra.mrb[0].mxu1 %vm186_vm1, %v67_v21 }
 0x182   :  { %v224_v31 = vpop.f32.mrb[0].mxu0  ;;  %v265_v32 = vpop.f32.mrb[0].mxu1 }
 0x183   :  { %v225_v33 = vadd.f32 %v224_v31, %v89_v28  ;;  %v226_v34 = vpop.f32.mrb[1].mxu0  ;;  %v267_v35 = vpop.f32.mrb[1].mxu1  ;;  %v266_v47 = vadd.f32 %v265_v32, %v97_v46 }
 0x184   :  { %v227_v36 = vadd.f32 %v226_v34, %v93_v29  ;;  %v268_v37 = vadd.f32 %v267_v35, %v101_v30  ;;  %v228_v38 = vpop.f32.mrb[2].mxu0  ;;  %v269_v39 = vpop.f32.mrb[2].mxu1 }
 0x185   :  { %v272_v40 = vmul.f32 0.5, %v225_v33  ;;  %v229_v41 = vpop.f32.mrb[3].mxu0  ;;  %v270_v42 = vpop.f32.mrb[3].mxu1 }
 0x186   :  { %v276_v44 = vmul.f32 0.5, %v227_v36  ;;  %v281_v45 = vmul.f32 0.5, %v268_v37 }
 0x187   :  { %378 = vtanh.f32 %v272_v40 }
 0x188   :  { %380 = vtanh.f32 %v276_v44 }
 0x189   :  { %382 = vtanh.f32 %v281_v45 }
 0x18a   :  { %384 = vtanh.f32 %v266_v47 }
 0x191   :  { %v379_v48 = vpop.eup %378 }
 0x192   :  { %v381_v49 = vpop.eup %380  ;;  %v274_v50 = vadd.f32 1.0, %v379_v48 }
 0x193   :  { %v383_v51 = vpop.eup %382  ;;  %v278_v52 = vadd.f32 1.0, %v381_v49 }
 0x194   :  { %v275_v53 = vmul.f32 0.5, %v274_v50  ;;  %v283_v55 = vadd.f32 1.0, %v383_v51  ;;  %v385_v60 = vpop.eup %384 }
 0x195   :  { %v279_v54 = vmul.f32 0.5, %v278_v52 }
 0x196   :  { %v285_v56 = vmul.f32 %v275_v53, %v60_v18  ;;  %v284_v58 = vmul.f32 0.5, %v283_v55 }
 0x197   :  { %v286_v57 = vmul.f32 %v279_v54, %v580_v1 }
 0x199   :  { %v287_v59 = vadd.f32 %v286_v57, %v285_v56 }
 0x19b   :  { %vm288_vm2 = vcmp.ge.f32.partialorder %v287_v59, %v284_v58 }
 0x19c   :  { %v343_v62 = vsel %vm288_vm2, 1.0, %v513_v61  ;;  %v291_v63 = vsel %vm288_vm2, 0.0, %v287_v59 }
 0x19d   :  { %293 = vst.msk [vmem:[#allocation8] sm:$0xff] %vm65_vm0, %v343_v62  ;;  %v292_v0 = vadd.f32 %v385_v60, %v291_v63 }
 0x19e   :  { %463 = shalt.err (!%p460_p0)
}
 0x19f   :  { %s464_s12 = scalar_lea.hbm %s618_s4, 128 }
 0x1a0   :  { %p465_p1 = scmp.ne.s32.totalorder %s618_s4, %s464_s12  ;;  %p468_p2 = scmp.lt.u32.totalorder %s464_s12, %s618_s4 }
 0x1a2   :  { %p470_p3 = pnand %p468_p2, %p465_p1 }
 0x1a4   :  { %473 = shalt.err (!%p470_p3)
}
 0x1a5   :  { %304 = dma.vmem_to_hbm [thread:$0]  %s302_s6, 128, %s618_s4, [#allocation4]   ;;  %294 = vst.msk [vmem:[#allocation9] sm:$0xff] %vm65_vm0, %v292_v0 }
 0x1a6   :  { %s474_s18 = scalar_lea.vmem %s312_s8, 128  ;;  %p479_p5 = scmp.lt.s32.totalorder %s312_s8, %s312_s8 }
 0x1a7   :  { %p475_p4 = scmp.ne.s32.totalorder %s312_s8, %s474_s18  ;;  %p480_p6 = scmp.lt.s32.totalorder %s474_s18, %s474_s18 }
 0x1a9   :  { %p481_p7 = por %p480_p6, %p479_p5 }
 0x1ab   :  { %p482_p8 = pnand %p481_p7, %p475_p4 }
 0x1ad   :  { %485 = shalt.err (!%p482_p8)
}
 0x1ae   :  { %s486_s22 = scalar_lea.hbm %s619_s5, 128 }
 0x1af   :  { %p487_p9 = scmp.ne.s32.totalorder %s619_s5, %s486_s22  ;;  %p490_p10 = scmp.lt.u32.totalorder %s486_s22, %s619_s5 }
 0x1b1   :  { %p492_p11 = pnand %p490_p10, %p487_p9 }
 0x1b3   :  { %495 = shalt.err (!%p492_p11)
}
 0x1b4   :  { %314 = dma.vmem_to_hbm [thread:$0]  %s312_s8, 128, %s619_s5, [#allocation10]  }
 0x1b5   :  { %500 = dma.done.wait [#allocation4], 128  }
 0x1b6   :  { %501 = vsyncadd [#allocation4], 4294967168 }
 0x1b7   :  { %502 = dma.done.wait [#allocation10], 128  }
 0x1b8   :  { %503 = vsyncadd [#allocation10], 4294967168 }
 0x1b9   :  { %321 = vsyncpa [#allocation3], 1 }
 0x1ba   :  { %322 = vsyncpa [#allocation6], 1 }
 0x1bb   :  { %323 = vsyncpa [#allocation4], 1 }
 0x1bc   :  { %324 = vsyncpa [#allocation10], 1 }

</bundles_post_ra>
